<compile_context>
chip_gen: v7x
topology: tpu7x:2x2x1
jax: 0.10.0
libtpu: 0.0.40
codegen_flags: <defaults>
</compile_context>

<pallas_src>
import functools

import jax
import jax.numpy as jnp
from jax.experimental import pallas as pl
from jax.experimental.pallas import tpu as pltpu


def _lifted_structure_loss_kernel(emb_ref, lab_col_ref, lab_row_ref, out_ref,
                                  *, margin):
    n, dim = emb_ref.shape

    # f32 copy for exact self-norms / elementwise math, bf16 copy for the MXU.
    e_f32 = emb_ref[...].astype(jnp.float32)               # (N, D)
    e_bf16 = emb_ref[...].astype(jnp.bfloat16)              # (N, D)

    # Gram matrix on the MXU: contract last dim of both operands (== e @ e.T
    # without materializing a transpose).  bf16 inputs, f32 accumulation.
    prod = jax.lax.dot_general(
        e_bf16, e_bf16,
        dimension_numbers=(((1,), (1,)), ((), ())),
        preferred_element_type=jnp.float32)                  # (N, N)

    # Squared self-norms in f32, straight from the embeddings.
    e_sq = e_f32 * e_f32                                     # (N, D)
    norm_col = jnp.sum(e_sq, axis=1, keepdims=True)          # (N, 1)  -> norm[i]
    # Lane-oriented copy of the same norms via a tiny matmul (avoids a
    # sublane->lane relayout of the (N,1) column).
    norm_row = jax.lax.dot_general(
        jnp.ones((1, dim), jnp.float32), e_sq,
        dimension_numbers=(((1,), (1,)), ((), ())),
        preferred_element_type=jnp.float32)                  # (1, N)  -> norm[j]

    # Pairwise Euclidean distances, clamped exactly like the reference pdist.
    d = jnp.sqrt(jnp.maximum(norm_col + norm_row - 2.0 * prod, 1e-12))  # (N, N)

    # Positive-pair mask from the pre-shaped label column / row.
    pos = lab_col_ref[...] == lab_row_ref[...]               # (N, N) bool

    # neg_i = ((margin - d).exp() * (1 - pos)).sum(1), clamped at 1e-12.
    # The masked exp matrix is symmetric, so its row sums and column sums give
    # neg_i in both broadcast orientations with no transpose.
    m = jnp.where(pos, 0.0, jnp.exp(margin - d))             # (N, N), one exp
    s_col = jnp.maximum(jnp.sum(m, axis=1, keepdims=True), 1e-12)   # (N, 1)
    s_row = jnp.maximum(jnp.sum(m, axis=0, keepdims=True), 1e-12)   # (1, N)

    # loss = sum(relu(pos.triu(1) * (log(neg_i + neg_i.T) + d))^2)
    #        / (pos.sum() - N + 1e-8)
    row_idx = jax.lax.broadcasted_iota(jnp.int32, (n, n), 0)
    col_idx = jax.lax.broadcasted_iota(jnp.int32, (n, n), 1)
    upper_pos = jnp.logical_and(pos, col_idx > row_idx)      # pos ∩ strict upper
    term = jnp.where(upper_pos,
                     jnp.maximum(jnp.log(s_col + s_row) + d, 0.0),
                     0.0)
    numerator = jnp.sum(term * term)
    denominator = jnp.sum(pos.astype(jnp.float32)) - jnp.float32(n) + 1e-8
    out_ref[0, 0] = numerator / denominator


def _vmem_estimate_bytes(n, dim):
    """Rough single-tile VMEM footprint (padded tiles, ~6 live NxN f32)."""
    n_sub = -(-n // 8) * 8
    n_lane = -(-n // 128) * 128
    d_lane = -(-dim // 128) * 128
    return 4 * (6 * n_sub * n_lane + 3 * n_sub * d_lane)


def lifted_structure_loss(embeddings, labels, margin=1.0):
    """embeddings: (N, D); labels: (N,) int  ->  scalar float32 loss."""
    n, dim = embeddings.shape
    if n > 2048:
        # Single-tile variant carries ~6 live NxN f32 arrays; beyond ~1-2k
        # rows a tiled two-pass grid is required to stay inside VMEM
        # (especially on v7x's 64 MiB).
        raise ValueError(
            "single-tile LiftedStructureLoss kernel supports N <= 2048")

    labels_col = labels.reshape(n, 1).astype(jnp.int32)
    labels_row = labels.reshape(1, n).astype(jnp.int32)

    compiler_params = None
    est = 2 * _vmem_estimate_bytes(n, dim)  # 2x headroom
    if est > 16 * 1024 * 1024:              # above the most conservative default (v5e)
        compiler_params = pltpu.CompilerParams(
            vmem_limit_bytes=min(est, 60 * 1024 * 1024))

    kernel = functools.partial(_lifted_structure_loss_kernel,
                               margin=float(margin))
    out = pl.pallas_call(
        kernel,
        out_shape=jax.ShapeDtypeStruct((1, 1), jnp.float32),
        in_specs=[
            pl.BlockSpec(memory_space=pltpu.MemorySpace.VMEM),  # embeddings (native dtype)
            pl.BlockSpec(memory_space=pltpu.MemorySpace.VMEM),  # labels (N, 1)
            pl.BlockSpec(memory_space=pltpu.MemorySpace.VMEM),  # labels (1, N)
        ],
        out_specs=pl.BlockSpec(memory_space=pltpu.MemorySpace.SMEM),
        compiler_params=compiler_params,
    )(embeddings, labels_col, labels_row)
    return out[0, 0]


if __name__ == "__main__":
    key = jax.random.PRNGKey(0)
    k_emb, k_lab = jax.random.split(key)

    N, D = 8, 32
    embeddings = jax.random.normal(k_emb, (N, D), dtype=jnp.float32)
    labels = jax.random.randint(k_lab, (N,), 0, 4)  # 8 samples, 4 classes

    loss = lifted_structure_loss(embeddings, labels, margin=1.0)
    jax.block_until_ready(loss)
    print("KERNEL_OK")
</pallas_src>

<mosaic_0001>
module attributes {stable_mosaic.version = 11 : i64} {
  func.func @_lifted_structure_loss_kernel(%arg0: memref<8x32xf32, #tpu.memory_space<vmem>>, %arg1: memref<8x1xi32, #tpu.memory_space<vmem>>, %arg2: memref<1x8xi32, #tpu.memory_space<vmem>>, %arg3: memref<1x1xf32, #tpu.memory_space<smem>>) attributes {dimension_semantics = [], scalar_prefetch = 0 : i64, scratch_operands = 0 : i64, tpu.core_type = #tpu.core_type<tc>} {
    %c0 = arith.constant 0 : index
    %c0_0 = arith.constant 0 : index
    %0 = vector.load %arg0[%c0, %c0_0] : memref<8x32xf32, #tpu.memory_space<vmem>>, vector<8x32xf32>
    %c0_1 = arith.constant 0 : index
    %c0_2 = arith.constant 0 : index
    %1 = vector.load %arg0[%c0_1, %c0_2] : memref<8x32xf32, #tpu.memory_space<vmem>>, vector<8x32xf32>
    %2 = arith.truncf %1 : vector<8x32xf32> to vector<8x32xbf16>
    %cst = arith.constant dense<0.000000e+00> : vector<8x8xf32>
    %3 = tpu.matmul %2, %2, %cst {dimension_numbers = #tpu.dot_dimension_numbers<[1], [1], [0], [0], [0, 0, 1, 0], [], []>} : vector<8x32xbf16>, vector<8x32xbf16>, vector<8x8xf32> -> vector<8x8xf32>
    %4 = arith.mulf %0, %0 : vector<8x32xf32>
    %cst_3 = arith.constant dense<0.000000e+00> : vector<8xf32>
    %5 = vector.multi_reduction <add>, %4, %cst_3 [1] : vector<8x32xf32> to vector<8xf32>
    %6 = vector.shape_cast %5 : vector<8xf32> to vector<8x1xf32>
    %cst_4 = arith.constant 1.000000e+00 : f32
    %7 = vector.broadcast %cst_4 : f32 to vector<1x32xf32>
    %cst_5 = arith.constant dense<0.000000e+00> : vector<1x8xf32>
    %8 = tpu.matmul %7, %4, %cst_5 {dimension_numbers = #tpu.dot_dimension_numbers<[1], [1], [0], [0], [0, 0, 1, 0], [], []>} : vector<1x32xf32>, vector<8x32xf32>, vector<1x8xf32> -> vector<1x8xf32>
    %9 = vector.broadcast %6 : vector<8x1xf32> to vector<8x8xf32>
    %10 = vector.broadcast %8 : vector<1x8xf32> to vector<8x8xf32>
    %11 = arith.addf %9, %10 : vector<8x8xf32>
    %cst_6 = arith.constant 2.000000e+00 : f32
    %12 = vector.broadcast %cst_6 : f32 to vector<8x8xf32>
    %13 = arith.mulf %12, %3 : vector<8x8xf32>
    %14 = arith.subf %11, %13 : vector<8x8xf32>
    %cst_7 = arith.constant 9.99999996E-13 : f32
    %15 = vector.broadcast %cst_7 : f32 to vector<8x8xf32>
    %16 = arith.maximumf %14, %15 : vector<8x8xf32>
    %17 = math.sqrt %16 : vector<8x8xf32>
    %c0_8 = arith.constant 0 : index
    %c0_9 = arith.constant 0 : index
    %18 = vector.load %arg1[%c0_8, %c0_9] : memref<8x1xi32, #tpu.memory_space<vmem>>, vector<8x1xi32>
    %c0_10 = arith.constant 0 : index
    %c0_11 = arith.constant 0 : index
    %19 = vector.load %arg2[%c0_10, %c0_11] : memref<1x8xi32, #tpu.memory_space<vmem>>, vector<1x8xi32>
    %20 = vector.broadcast %18 : vector<8x1xi32> to vector<8x8xi32>
    %21 = vector.broadcast %19 : vector<1x8xi32> to vector<8x8xi32>
    %22 = arith.cmpi eq, %20, %21 : vector<8x8xi32>
    %cst_12 = arith.constant 1.000000e+00 : f32
    %23 = vector.broadcast %cst_12 : f32 to vector<8x8xf32>
    %24 = arith.subf %23, %17 : vector<8x8xf32>
    %25 = math.exp %24 : vector<8x8xf32>
    %cst_13 = arith.constant 0.000000e+00 : f32
    %26 = vector.broadcast %cst_13 : f32 to vector<8x8xf32>
    %27 = arith.select %22, %26, %25 : vector<8x8xi1>, vector<8x8xf32>
    %cst_14 = arith.constant dense<0.000000e+00> : vector<8xf32>
    %28 = vector.multi_reduction <add>, %27, %cst_14 [1] : vector<8x8xf32> to vector<8xf32>
    %29 = vector.shape_cast %28 : vector<8xf32> to vector<8x1xf32>
    %cst_15 = arith.constant 9.99999996E-13 : f32
    %30 = vector.broadcast %cst_15 : f32 to vector<8x1xf32>
    %31 = arith.maximumf %29, %30 : vector<8x1xf32>
    %cst_16 = arith.constant dense<0.000000e+00> : vector<8xf32>
    %32 = vector.multi_reduction <add>, %27, %cst_16 [0] : vector<8x8xf32> to vector<8xf32>
    %33 = vector.shape_cast %32 : vector<8xf32> to vector<1x8xf32>
    %cst_17 = arith.constant 9.99999996E-13 : f32
    %34 = vector.broadcast %cst_17 : f32 to vector<1x8xf32>
    %35 = arith.maximumf %33, %34 : vector<1x8xf32>
    %36 = tpu.iota {dimensions = array<i32: 0>} : vector<8x8xi32>
    %37 = tpu.iota {dimensions = array<i32: 1>} : vector<8x8xi32>
    %38 = arith.cmpi sgt, %37, %36 : vector<8x8xi32>
    %39 = arith.andi %22, %38 : vector<8x8xi1>
    %40 = vector.broadcast %31 : vector<8x1xf32> to vector<8x8xf32>
    %41 = vector.broadcast %35 : vector<1x8xf32> to vector<8x8xf32>
    %42 = arith.addf %40, %41 : vector<8x8xf32>
    %43 = math.log %42 : vector<8x8xf32>
    %44 = arith.addf %43, %17 : vector<8x8xf32>
    %cst_18 = arith.constant 0.000000e+00 : f32
    %45 = vector.broadcast %cst_18 : f32 to vector<8x8xf32>
    %46 = arith.maximumf %44, %45 : vector<8x8xf32>
    %cst_19 = arith.constant 0.000000e+00 : f32
    %47 = vector.broadcast %cst_19 : f32 to vector<8x8xf32>
    %48 = arith.select %39, %46, %47 : vector<8x8xi1>, vector<8x8xf32>
    %49 = arith.mulf %48, %48 : vector<8x8xf32>
    %50 = vector.shape_cast %49 : vector<8x8xf32> to vector<1x8x8xf32>
    %cst_20 = arith.constant dense<0.000000e+00> : vector<1xf32>
    %51 = vector.multi_reduction <add>, %50, %cst_20 [1, 2] : vector<1x8x8xf32> to vector<1xf32>
    %52 = vector.shape_cast %51 : vector<1xf32> to vector<1x1x1xf32>
    %53 = vector.extract %52[0, 0, 0] : f32 from vector<1x1x1xf32>
    %54 = arith.extui %22 : vector<8x8xi1> to vector<8x8xi32>
    %55 = arith.sitofp %54 : vector<8x8xi32> to vector<8x8xf32>
    %56 = vector.shape_cast %55 : vector<8x8xf32> to vector<1x8x8xf32>
    %cst_21 = arith.constant dense<0.000000e+00> : vector<1xf32>
    %57 = vector.multi_reduction <add>, %56, %cst_21 [1, 2] : vector<1x8x8xf32> to vector<1xf32>
    %58 = vector.shape_cast %57 : vector<1xf32> to vector<1x1x1xf32>
    %59 = vector.extract %58[0, 0, 0] : f32 from vector<1x1x1xf32>
    %cst_22 = arith.constant 8.000000e+00 : f32
    %60 = arith.subf %59, %cst_22 : f32
    %cst_23 = arith.constant 9.99999993E-9 : f32
    %61 = arith.addf %60, %cst_23 : f32
    %62 = arith.divf %53, %61 : f32
    %c0_24 = arith.constant 0 : index
    %c0_25 = arith.constant 0 : index
    %63 = memref.load %arg3[%c0_24, %c0_25] : memref<1x1xf32, #tpu.memory_space<smem>>
    memref.store %62, %arg3[%c0_24, %c0_25] : memref<1x1xf32, #tpu.memory_space<smem>>
    return
  }
}

</mosaic_0001>

<bundles_post_ra>
// kernel: tpu_custom_call.1
= control target key start
LH: loop header
LB: loop body
LE: loop exit
PB: predicated region body
PF: predicated region fallthrough
CT: control target
= control target key end

     0   :  { %vm18_vm0 = vcmask 261120   ;;  %v292_v1 = vmov 0.0   ;;  %s355_s0 = inlined_call_operand.vmem [shape: f32[8,32], index: 0, kind: input, shape index: {}]   ;;  %s356_s1 = inlined_call_operand.vmem [shape: s32[8,1], index: 1, kind: input, shape index: {}]   ;;  %s357_s2 = inlined_call_operand.vmem [shape: s32[1,8], index: 2, kind: input, shape index: {}]   ;;  %s358_s3 = inlined_call_operand.hbm [shape: f32[1,1], index: 3, kind: output, shape index: {}]  }
   0x1   :  { %v16_v0 = vld [vmem:[%s355_s0] sm:$0xff]  ;;  %249 = vmatprep.subr.bf16.mxu0 %v292_v1  ;;  %255 = vmatprep.subr.mxu1 %v292_v1 }
   0x2   :  { %v17_v2 = vpack.c.bf16 %v16_v0, %v16_v0  ;;  %v62_v3 = vmul.f32 %v16_v0, %v16_v0 }
   0x3   :  { %8 = vsyncpa [#allocation3], 0  ;;  %vm293_vm1 = vmmov 0   ;;  %v294_v6 = vmov 0   ;;  %v295_v7 = vmov 1.0   ;;  %v157_v8 = vld [vmem:[%s356_s1] sm:$0xff]  ;;  %v142_v9 = vlaneseq }
   0x4   :  { %257 = vmatprep.mubr.msk.f32.mxu1 %vm293_vm1, %v292_v1  ;;  %251 = vmatprep.mubr.msk.bf16.mxu0 %vm293_vm1, %v292_v1  ;;  %v20_v4 = vsel %vm18_vm0, %v17_v2, 0  ;;  %v63_v5 = vsel %vm18_vm0, %v62_v3, 0.0  ;;  %v242_v32 = vld [vmem:[%s357_s2] ss:$0 sm:$0xff]  ;;  %vm171_vm6 = vcmask 64512   ;;  %s280_s23 = scalar_lea.hbm %s358_s3, 16 }
   0x5   :  { %256 = vmatpush3.xpose.msk.msra.mxu1 %vm18_vm0, %v62_v3  ;;  %271 = vset.pattern.permute.xlu0 %v294_v6  ;;  %v143_v10 = vshrl.u32 %v142_v9, 7  ;;  %v186_v11 = vand.u32 127, %v142_v9  ;;  %p281_p0 = scmp.ne.s32.totalorder %s358_s3, %s280_s23  ;;  %p284_p1 = scmp.lt.u32.totalorder %s280_s23, %s358_s3 }
   0x6   :  { %250 = vmatpush3.bf16.xpose.msra.mxu0 %v20_v4  ;;  %64 = vadd.xlane.f32.xlu0 %v63_v5 }
   0x7   :  { %vm187_vm2 = vcmp.gt.s32.totalorder %v186_v11, %v143_v10  ;;  %v144_v12 = vsub.s32 0, %v143_v10  ;;  %p286_p2 = pnand %p284_p1, %p281_p0 }
   0x8   :  { %258 = vmatmul.mubr.msk.f32.vlgmr.msra.gmra.mrb[0].mxu1 %vm18_vm0, %v295_v7 }
   0xd   :  { %252 = vmatmul.mubr.msk.bf16.vlgmr.msra.gmra.mrb[0].mxu0 %vm18_vm0, %v17_v2 }
  0x1c   :  { %160 = vperm.xlu0 %271, %v157_v8  }
  0x93   :  { %v65_v16 = vpop.xlane.xlu0 %64 }
  0x9b   :  { %v161_v33 = vpop.permute.xlu0 %160 }
  0x9c   :  { %vm166_vm5 = vcmp.eq.s32.totalorder %v161_v33, %v242_v32 }
  0x9d   :  { %vm188_vm7 = vmand %vm166_vm5, %vm187_vm2  ;;  %v243_v54 = vsel %vm166_vm5, 1.0, %v292_v1 }
  0x9e   :  { %v208_v55 = vsel %vm171_vm6, %v243_v54, 0.0 }
  0xdb   :  { %v138_v13 = vpop.f32.mrb[0].mxu1 }
  0xdc   :  { %v145_v14 = vrot.slane %v138_v13, %v144_v12  ;;  %v259_v15 = vpop.f32.mrb[1].mxu1 }
  0xde   :  { %v146_v17 = vadd.f32 %v145_v14, %v65_v16 }
  0xe0   :  { %v56_v18 = vpop.f32.mrb[0].mxu0 }
  0xe1   :  { %v147_v19 = vmul.f32 2.0, %v56_v18  ;;  %v253_v20 = vpop.f32.mrb[1].mxu0 }
  0xe2   :  { %v59_v21 = vpop.f32.mrb[2].mxu0 }
  0xe3   :  { %v148_v22 = vsub.f32 %v146_v17, %v147_v19  ;;  %v254_v23 = vpop.f32.mrb[3].mxu0 }
  0xe5   :  { %v149_v24 = vmax.f32 %v148_v22, 1e-12 }
  0xe7   :  { %272 = vrsqrt.f32 %v149_v24  ;;  %vm152_vm3 = vcmp.eq.f32.partialorder %v149_v24, inf  ;;  %v155_v27 = vand.u32 2147483648, %v149_v24  ;;  %vm154_vm4 = vcmp.eq.f32.partialorder %v149_v24, 0.0 }
  0xf1   :  { %v273_v25 = vpop.eup %272 }
  0xf2   :  { %v151_v26 = vmul.f32 %v273_v25, %v149_v24 }
  0xf4   :  { %v153_v28 = vsel %vm152_vm3, %v149_v24, %v151_v26 }
  0xf5   :  { %v156_v29 = vsel %vm154_vm4, %v155_v27, %v153_v28 }
  0xf6   :  { %v167_v30 = vsub.f32 1.0, %v156_v29 }
  0xf8   :  { %v168_v31 = vmul.f32 1.442695, %v167_v30 }
  0xfa   :  { %274 = vpow2.f32 %v168_v31 }
 0x104   :  { %v275_v34 = vpop.eup %274 }
 0x105   :  { %v170_v35 = vsel %vm166_vm5, 0.0, %v275_v34 }
 0x106   :  { %v172_v36 = vsel %vm171_vm6, %v170_v35, 0.0 }
 0x107   :  { %173 = vadd.xlane.f32.xlu1 %v172_v36  ;;  %v176_v37 = vrot.slane %v172_v36, 4 }
 0x109   :  { %v177_v38 = vadd.f32 %v176_v37, %v172_v36 }
 0x10b   :  { %v178_v39 = vrot.slane %v177_v38, 2 }
 0x10d   :  { %v179_v40 = vadd.f32 %v178_v39, %v177_v38 }
 0x10f   :  { %v180_v41 = vrot.slane %v179_v40, 1 }
 0x111   :  { %v181_v42 = vadd.f32 %v180_v41, %v179_v40 }
 0x113   :  { %v182_v45 = vmax.f32 %v181_v42, 1e-12 }
 0x194   :  { %v174_v43 = vpop.xlane.xlu1 %173 }
 0x195   :  { %v175_v44 = vmax.f32 %v174_v43, 1e-12 }
 0x197   :  { %v189_v46 = vadd.f32 %v182_v45, %v175_v44 }
 0x199   :  { %276 = vlog2.f32 %v189_v46 }
 0x1a3   :  { %v277_v47 = vpop.eup %276 }
 0x1a4   :  { %v191_v48 = vmul.f32 0.6931472, %v277_v47 }
 0x1a6   :  { %v192_v49 = vadd.f32 %v191_v48, %v156_v29 }
 0x1a8   :  { %v193_v50 = vmax.f32 %v192_v49, 0.0 }
 0x1aa   :  { %v194_v51 = vsel %vm188_vm7, %v193_v50, 0.0 }
 0x1ab   :  { %v195_v52 = vmul.f32 %v194_v51, %v194_v51 }
 0x1ad   :  { %v196_v53 = vsel %vm171_vm6, %v195_v52, 0.0 }
 0x1ae   :  { %197 = vadd.xlane.f32.xlu1 %v196_v53 }
 0x1b2   :  { %209 = vadd.xlane.f32.xlu1 %v208_v55 }
 0x23b   :  { %v198_v56 = vpop.xlane.xlu1 %197 }
 0x23c   :  { %v199_v57 = vrot.slane %v198_v56, 4 }
 0x23e   :  { %v200_v58 = vadd.f32 %v199_v57, %v198_v56 }
 0x23f   :  { %v210_v59 = vpop.xlane.xlu1 %209 }
 0x240   :  { %v201_v60 = vrot.slane %v200_v58, 2  ;;  %v211_v61 = vrot.slane %v210_v59, 4 }
 0x242   :  { %v212_v62 = vadd.f32 %v211_v61, %v210_v59  ;;  %v202_v63 = vadd.f32 %v201_v60, %v200_v58 }
 0x244   :  { %v213_v0 = vrot.slane %v212_v62, 2  ;;  %v203_v2 = vrot.slane %v202_v63, 1 }
 0x246   :  { %v214_v3 = vadd.f32 %v213_v0, %v212_v62  ;;  %v204_v4 = vadd.f32 %v203_v2, %v202_v63 }
 0x248   :  { %260 = vpush %v204_v4  ;;  %v215_v5 = vrot.slane %v214_v3, 1 }
 0x24a   :  { %v216_v6 = vadd.f32 %v215_v5, %v214_v3 }
 0x24c   :  { %262 = vpush %v216_v6 }
 0x279   :  { %s261_s2 = spop %260 }
 0x27d   :  { %s263_s16 = spop %262 }
 0x27e   :  { %s244_s17 = sadd.f32 -8.0, %s263_s16 }
 0x280   :  { %s219_s18 = sadd.f32 1e-08, %s244_s17 }
 0x282   :  { %v220_v1 = vstv %s219_s18 }
 0x283   :  { %278 = vrcp.f32 %v220_v1 }
 0x28d   :  { %v279_v7 = vpop.eup %278 }
 0x28e   :  { %264 = vpush %v279_v7 }
 0x2bf   :  { %s265_s19 = spop %264 }
 0x2c0   :  { %s223_s20 = smul.f32 %s265_s19, %s261_s2 }
 0x2c2   :  { %225 = sst [smem:[#allocation2]] %s223_s20 }
 0x2c3   :  { %289 = shalt.err (!%p286_p2)
}
 0x2c4   :  { %s296_s28 = smov [#allocation2]  }
 0x2c5   :  { %233 = dma.smem_to_hbm %s296_s28, 16, %s358_s3, [#allocation3]  }
 0x2c6   :  { %290 = dma.done.wait [#allocation3], 16  }
 0x2c7   :  { %291 = vsyncadd [#allocation3], 4294967280 }
 0x2c8   :  { %237 = sfence }
 0x2c9   :  { %238 = vsyncpa [#allocation3], 1 }

</bundles_post_ra>
